<compile_context>
chip_gen: v5e
topology: v5e:2x2
jax: 0.10.0
libtpu: 0.0.40
codegen_flags: <defaults>
</compile_context>

<pallas_src>
import math

import jax
import jax.numpy as jnp
from jax.experimental import pallas as pl
from jax.experimental.pallas import tpu as pltpu

DX = DY = DZ = 0.02
DR = math.pi / 8.0
N_A = 5
LOG_2PI = math.log(2.0 * math.pi)
OUTW = 16   # packed output lanes: [act(5) | uact(5) | logp | ent | val | pad(3)]


def _make_kernel(tk):
    def _actor_critic_kernel(x_ref, w1_ref, state_ref, w1s_ref, b1_ref,
                             w2_ref, b2_ref, std_ref, consts_ref,
                             lo_ref, half_ref, eps_ref,
                             out_ref, acc_ref):
        k = pl.program_id(1)

        @pl.when(k == 0)
        def _():
            # analytic fold of the constant tiled state channel + bias
            acc_ref[...] = state_ref[...] * w1s_ref[...] + b1_ref[...]

        # Streamed fused first-layer matmul (actor hidden | critic hidden).
        # W1 is VMEM-resident; slice the current K chunk of it.
        start = pl.multiple_of(k * tk, tk)
        w1_blk = w1_ref[pl.ds(start, tk), :]
        acc_ref[...] += jnp.dot(x_ref[...].astype(jnp.bfloat16), w1_blk,
                                preferred_element_type=jnp.float32)

        @pl.when(k == pl.num_programs(1) - 1)
        def _():
            h = jnp.maximum(acc_ref[...], 0.0)

            # Fused second layer: cols 0:5 -> actor mean, col 5 -> critic value.
            out2 = jnp.dot(h, w2_ref[...],
                           preferred_element_type=jnp.float32) + b2_ref[...]
            mean = out2[:, 0:N_A]
            value = out2[:, N_A:N_A + 1]

            eps = eps_ref[...]                               # [TB, N_A]
            action = mean + std_ref[...] * eps               # Normal rsample

            # log_prob(rsample): (action - mean) == std*eps
            #   sum logp = -0.5*sum(eps^2) + (-sum(logstd) - 0.5*n_a*log(2*pi))
            logp = (-0.5 * jnp.sum(eps * eps, axis=1, keepdims=True)
                    + consts_ref[:, 0:1])                    # [TB, 1]
            # entropy sum is batch independent
            ent = jnp.zeros_like(logp) + consts_ref[:, 1:2]  # [TB, 1]

            # decodeActions: 0.5*(u + 1)*(hi - lo) + lo == (u + 1)*half + lo
            scaled = (action + 1.0) * half_ref[...] + lo_ref[...]

            pad = jnp.zeros((scaled.shape[0], OUTW - (2 * N_A + 3)), jnp.float32)
            out_ref[...] = jnp.concatenate(
                [scaled, action, logp, ent, value, pad], axis=1)

    return _actor_critic_kernel


def evaluate(state, obs, params, eps, *, tb=256, tk=4096):
    """Mirrors robot_actor_critic.evaluate (non-equivariant branch, action=None).

    Returns (actions, unscaled_actions, log_prob_sum, entropy_sum, value).
    """
    w1a, b1a, w2a, b2a, actor_logstd, w1c, b1c, w2c, b2c = params
    B, C, H, W = obs.shape
    hw = H * W
    d_obs = C * hw                       # features coming from obs
    hid = w1a.shape[1]
    hf = 2 * hid                         # fused hidden width (actor | critic)
    assert w1a.shape[0] == d_obs + hw, "first-layer weights expect [obs ; state] features"

    tb = min(tb, B)
    tk = min(tk, d_obs)
    assert B % tb == 0, (B, tb)
    assert d_obs % tk == 0, (d_obs, tk)

    # --- fuse & split parameters (cheap, plain JAX, once per call) -----------------
    # obs part of the first layer, actor|critic fused along the output dim (bf16,
    # VMEM-resident in the kernel)
    w1_fused = jnp.concatenate([w1a[:d_obs], w1c[:d_obs]],
                               axis=1).astype(jnp.bfloat16)               # [d_obs, hf]
    # analytic fold of the tiled state channel: column sums of the state rows
    w1s_fused = jnp.concatenate([jnp.sum(w1a[d_obs:], axis=0, keepdims=True),
                                 jnp.sum(w1c[d_obs:], axis=0, keepdims=True)],
                                axis=1)                                   # [1, hf]
    b1_fused = jnp.concatenate([b1a, b1c], axis=1)                        # [1, hf]

    # zero-padded fused second layer: cols 0:5 = actor mean, col 5 = critic value
    p2 = 8
    w2_fused = jnp.zeros((hf, p2), jnp.float32)
    w2_fused = w2_fused.at[:hid, :N_A].set(w2a)
    w2_fused = w2_fused.at[hid:, N_A:N_A + 1].set(w2c)
    b2_fused = jnp.zeros((1, p2), jnp.float32)
    b2_fused = b2_fused.at[:, :N_A].set(b2a)
    b2_fused = b2_fused.at[:, N_A:N_A + 1].set(b2c)

    # batch-independent scalars hoisted out of the kernel epilogue
    std = jnp.exp(actor_logstd).astype(jnp.float32)                       # [1, N_A]
    logstd_sum = jnp.sum(actor_logstd)
    logp_const = -logstd_sum - 0.5 * N_A * LOG_2PI
    ent_const = N_A * (0.5 + 0.5 * LOG_2PI) + logstd_sum
    consts = jnp.reshape(jnp.stack([logp_const, ent_const]),
                         (1, 2)).astype(jnp.float32)                      # [1, 2]

    # decodeActions ranges, passed as inputs (NOT captured constants)
    lo = jnp.array([[0.0, -DX, -DY, -DZ, -DR]], dtype=jnp.float32)        # [1, N_A]
    half_span = jnp.array([[0.5, DX, DY, DZ, DR]], dtype=jnp.float32)     # [1, N_A]

    # x stays f32 in HBM; the bf16 cast happens in-kernel right before the dot.
    x = obs.reshape(B, d_obs).astype(jnp.float32)
    state2d = state.reshape(B, 1).astype(jnp.float32)
    eps = eps.astype(jnp.float32)

    nb = pl.cdiv(B, tb)
    nk = pl.cdiv(d_obs, tk)

    grid_spec = pltpu.PrefetchScalarGridSpec(
        num_scalar_prefetch=0,
        grid=(nb, nk),
        in_specs=[
            pl.BlockSpec((tb, tk), lambda b, k: (b, k)),        # x (f32, streamed)
            pl.BlockSpec((d_obs, hf), lambda b, k: (0, 0)),     # W1 fused (bf16, resident)
            pl.BlockSpec((tb, 1), lambda b, k: (b, 0)),         # state
            pl.BlockSpec((1, hf), lambda b, k: (0, 0)),         # state-channel colsum
            pl.BlockSpec((1, hf), lambda b, k: (0, 0)),         # b1 fused
            pl.BlockSpec((hf, p2), lambda b, k: (0, 0)),        # W2 fused
            pl.BlockSpec((1, p2), lambda b, k: (0, 0)),         # b2 fused
            pl.BlockSpec((1, N_A), lambda b, k: (0, 0)),        # std = exp(logstd)
            pl.BlockSpec((1, 2), lambda b, k: (0, 0)),          # [logp_const, ent_const]
            pl.BlockSpec((1, N_A), lambda b, k: (0, 0)),        # lo
            pl.BlockSpec((1, N_A), lambda b, k: (0, 0)),        # half_span
            pl.BlockSpec((tb, N_A), lambda b, k: (b, 0)),       # eps
        ],
        out_specs=pl.BlockSpec((tb, OUTW), lambda b, k: (b, 0)),
        scratch_shapes=[pltpu.VMEM((tb, hf), jnp.float32)],
    )

    cost = pl.CostEstimate(
        flops=2 * B * d_obs * hf + 2 * B * hf * p2,
        transcendentals=0,
        bytes_accessed=B * d_obs * 4 + d_obs * hf * 2 + B * (OUTW + N_A + 1) * 4,
    )

    packed = pl.pallas_call(
        _make_kernel(tk),
        out_shape=jax.ShapeDtypeStruct((B, OUTW), jnp.float32),
        grid_spec=grid_spec,
        compiler_params=pltpu.CompilerParams(
            dimension_semantics=("parallel", "arbitrary"),
            vmem_limit_bytes=64 * 1024 * 1024),
        cost_estimate=cost,
    )(x, w1_fused, state2d, w1s_fused, b1_fused, w2_fused, b2_fused,
      std, consts, lo, half_span, eps)

    actions = packed[:, 0:N_A]
    unscaled_actions = packed[:, N_A:2 * N_A]
    log_prob = packed[:, 2 * N_A]
    entropy = packed[:, 2 * N_A + 1]
    value = packed[:, 2 * N_A + 2:2 * N_A + 3]
    return actions, unscaled_actions, log_prob, entropy, value


def _reference(state, obs, params, eps):
    """Pure-JAX reference of the same forward pass.  Mirrors the kernel's bf16
    rounding of the first-layer (obs) matmul operands so the comparison is tight;
    all other math is f32."""
    w1a, b1a, w2a, b2a, logstd, w1c, b1c, w2c, b2c = params
    B, C, H, W = obs.shape
    d_obs = C * H * W
    xq = obs.reshape(B, d_obs).astype(jnp.bfloat16).astype(jnp.float32)
    hp = jax.lax.Precision.HIGHEST

    def head(w1, b1, w2, b2):
        w1q = w1[:d_obs].astype(jnp.bfloat16).astype(jnp.float32)
        h = (jnp.dot(xq, w1q, precision=hp)
             + state[:, None] * jnp.sum(w1[d_obs:], axis=0) + b1)
        return jnp.dot(jnp.maximum(h, 0.0), w2, precision=hp) + b2

    mean = head(w1a, b1a, w2a, b2a)
    value = head(w1c, b1c, w2c, b2c)
    std = jnp.exp(logstd)
    action = mean + std * eps
    logp = (-((action - mean) ** 2) / (2.0 * std * std)
            - logstd - 0.5 * LOG_2PI).sum(axis=1)
    ent = jnp.broadcast_to(0.5 + 0.5 * LOG_2PI + logstd, mean.shape).sum(axis=1)
    lo = jnp.array([0.0, -DX, -DY, -DZ, -DR], jnp.float32)
    hi = jnp.array([1.0, DX, DY, DZ, DR], jnp.float32)
    acts = 0.5 * (action + 1.0) * (hi - lo) + lo
    return acts, action, logp, ent, value


if __name__ == "__main__":
    key = jax.random.PRNGKey(0)
    B, C, H, W = 32, 2, 16, 16        # small stand-in for obs_shape=(2, 128, 128)
    HID = 32
    D = (C + 1) * H * W               # actor/critic input feats = [obs ; tiled state]

    ks = jax.random.split(key, 8)
    obs = jax.random.normal(ks[0], (B, C, H, W), dtype=jnp.float32)
    state = jax.random.uniform(ks[1], (B,), dtype=jnp.float32)
    eps = jax.random.normal(ks[2], (B, N_A), dtype=jnp.float32)   # pre-drawn rsample noise

    def xavier_uniform(k, shape):
        limit = math.sqrt(6.0 / (shape[0] + shape[1]))
        return jax.random.uniform(k, shape, jnp.float32, -limit, limit)

    # weights_init: xavier_uniform Linear weights, zero biases; actor_logstd parameter
    w1a = xavier_uniform(ks[3], (D, HID)); b1a = jnp.zeros((1, HID), jnp.float32)
    w2a = xavier_uniform(ks[4], (HID, N_A)); b2a = jnp.zeros((1, N_A), jnp.float32)
    actor_logstd = 0.1 * jax.random.normal(ks[5], (1, N_A), dtype=jnp.float32)
    w1c = xavier_uniform(ks[6], (D, HID)); b1c = jnp.zeros((1, HID), jnp.float32)
    w2c = xavier_uniform(ks[7], (HID, 1)); b2c = jnp.zeros((1, 1), jnp.float32)

    params = (w1a, b1a, w2a, b2a, actor_logstd, w1c, b1c, w2c, b2c)

    # tk=256 (< d_obs=512) exercises the streamed K accumulation + resident-W1 slicing,
    # tb=16 (< B=32) exercises the parallel batch tiling.
    outs = jax.block_until_ready(evaluate(state, obs, params, eps, tb=16, tk=256))
    refs = _reference(state, obs, params, eps)

    names = ("actions", "unscaled_actions", "log_prob", "entropy", "value")
    for name, o, r in zip(names, outs, refs):
        assert o.shape == r.shape, (name, o.shape, r.shape)
        err = float(jnp.max(jnp.abs(o - r)))
        # tolerance covers bf16 first-layer operands / MXU pass-count differences
        assert jnp.allclose(o, r, atol=5e-3, rtol=5e-3), (name, err)

    print("KERNEL_OK")
</pallas_src>

<mosaic_0001>
module attributes {stable_mosaic.version = 11 : i64} {
  func.func @_actor_critic_kernel(%arg0: i32, %arg1: i32, %arg2: memref<16x256xf32, #tpu.memory_space<vmem>>, %arg3: memref<512x64xbf16, #tpu.memory_space<vmem>>, %arg4: memref<16x1xf32, #tpu.memory_space<vmem>>, %arg5: memref<1x64xf32, #tpu.memory_space<vmem>>, %arg6: memref<1x64xf32, #tpu.memory_space<vmem>>, %arg7: memref<64x8xf32, #tpu.memory_space<vmem>>, %arg8: memref<1x8xf32, #tpu.memory_space<vmem>>, %arg9: memref<1x5xf32, #tpu.memory_space<vmem>>, %arg10: memref<1x2xf32, #tpu.memory_space<vmem>>, %arg11: memref<1x5xf32, #tpu.memory_space<vmem>>, %arg12: memref<1x5xf32, #tpu.memory_space<vmem>>, %arg13: memref<16x5xf32, #tpu.memory_space<vmem>>, %arg14: memref<16x16xf32, #tpu.memory_space<vmem>>, %arg15: memref<16x64xf32, #tpu.memory_space<vmem>>) attributes {dimension_semantics = [#tpu.dimension_semantics<parallel>, #tpu.dimension_semantics<arbitrary>], iteration_bounds = array<i64: 2, 2>, scalar_prefetch = 0 : i64, scratch_operands = 1 : i64, tpu.core_type = #tpu.core_type<tc>, window_params = [{transform_indices = @transform_0, window_bounds = array<i64: 16, 256>}, {pipeline_mode = #tpu.pipeline_mode<synchronous>, transform_indices = @transform_1, window_bounds = array<i64: 512, 64>}, {transform_indices = @transform_2, window_bounds = array<i64: 16, 1>}, {pipeline_mode = #tpu.pipeline_mode<synchronous>, transform_indices = @transform_3, window_bounds = array<i64: 1, 64>}, {pipeline_mode = #tpu.pipeline_mode<synchronous>, transform_indices = @transform_4, window_bounds = array<i64: 1, 64>}, {pipeline_mode = #tpu.pipeline_mode<synchronous>, transform_indices = @transform_5, window_bounds = array<i64: 64, 8>}, {pipeline_mode = #tpu.pipeline_mode<synchronous>, transform_indices = @transform_6, window_bounds = array<i64: 1, 8>}, {pipeline_mode = #tpu.pipeline_mode<synchronous>, transform_indices = @transform_7, window_bounds = array<i64: 1, 5>}, {pipeline_mode = #tpu.pipeline_mode<synchronous>, transform_indices = @transform_8, window_bounds = array<i64: 1, 2>}, {pipeline_mode = #tpu.pipeline_mode<synchronous>, transform_indices = @transform_9, window_bounds = array<i64: 1, 5>}, {pipeline_mode = #tpu.pipeline_mode<synchronous>, transform_indices = @transform_10, window_bounds = array<i64: 1, 5>}, {transform_indices = @transform_11, window_bounds = array<i64: 16, 5>}, {transform_indices = @transform_12, window_bounds = array<i64: 16, 16>}]} {
    %c0_i32 = arith.constant 0 : i32
    %0 = arith.cmpi eq, %arg1, %c0_i32 : i32
    %1 = arith.extui %0 : i1 to i32
    %c0_i32_0 = arith.constant 0 : i32
    %2 = arith.cmpi ne, %1, %c0_i32_0 : i32
    scf.if %2 {
      %c0_8 = arith.constant 0 : index
      %c0_9 = arith.constant 0 : index
      %16 = vector.load %arg4[%c0_8, %c0_9] : memref<16x1xf32, #tpu.memory_space<vmem>>, vector<16x1xf32>
      %c0_10 = arith.constant 0 : index
      %c0_11 = arith.constant 0 : index
      %17 = vector.load %arg5[%c0_10, %c0_11] : memref<1x64xf32, #tpu.memory_space<vmem>>, vector<1x64xf32>
      %18 = vector.broadcast %16 : vector<16x1xf32> to vector<16x64xf32>
      %19 = vector.broadcast %17 : vector<1x64xf32> to vector<16x64xf32>
      %20 = arith.mulf %18, %19 : vector<16x64xf32>
      %c0_12 = arith.constant 0 : index
      %c0_13 = arith.constant 0 : index
      %21 = vector.load %arg6[%c0_12, %c0_13] : memref<1x64xf32, #tpu.memory_space<vmem>>, vector<1x64xf32>
      %22 = vector.broadcast %21 : vector<1x64xf32> to vector<16x64xf32>
      %23 = arith.addf %20, %22 : vector<16x64xf32>
      %c0_14 = arith.constant 0 : index
      %c0_15 = arith.constant 0 : index
      %24 = vector.load %arg15[%c0_14, %c0_15] : memref<16x64xf32, #tpu.memory_space<vmem>>, vector<16x64xf32>
      tpu.vector_store %arg15[%c0_14, %c0_15], %23 {strides = array<i32>} : memref<16x64xf32, #tpu.memory_space<vmem>>, vector<16x64xf32>,
    } else {
    }
    %c256_i32 = arith.constant 256 : i32
    %3 = arith.muli %arg1, %c256_i32 : i32
    %4 = tpu.assume_multiple %3, 256 : i32
    %5 = arith.index_cast %4 : i32 to index
    %c0 = arith.constant 0 : index
    %6 = vector.load %arg3[%5, %c0] : memref<512x64xbf16, #tpu.memory_space<vmem>>, vector<256x64xbf16>
    %c0_1 = arith.constant 0 : index
    %c0_2 = arith.constant 0 : index
    %7 = vector.load %arg15[%c0_1, %c0_2] : memref<16x64xf32, #tpu.memory_space<vmem>>, vector<16x64xf32>
    %c0_3 = arith.constant 0 : index
    %c0_4 = arith.constant 0 : index
    %8 = vector.load %arg2[%c0_3, %c0_4] : memref<16x256xf32, #tpu.memory_space<vmem>>, vector<16x256xf32>
    %9 = arith.truncf %8 : vector<16x256xf32> to vector<16x256xbf16>
    %cst = arith.constant dense<0.000000e+00> : vector<16x64xf32>
    %10 = tpu.matmul %9, %6, %cst {dimension_numbers = #tpu.dot_dimension_numbers<[1], [0], [0], [1], [0, 0, 1, 1], [], []>} : vector<16x256xbf16>, vector<256x64xbf16>, vector<16x64xf32> -> vector<16x64xf32>
    %11 = arith.addf %7, %10 : vector<16x64xf32>
    %c0_5 = arith.constant 0 : index
    %c0_6 = arith.constant 0 : index
    %12 = vector.load %arg15[%c0_5, %c0_6] : memref<16x64xf32, #tpu.memory_space<vmem>>, vector<16x64xf32>
    tpu.vector_store %arg15[%c0_5, %c0_6], %11 {strides = array<i32>} : memref<16x64xf32, #tpu.memory_space<vmem>>, vector<16x64xf32>,
    %c1_i32 = arith.constant 1 : i32
    %13 = arith.cmpi eq, %arg1, %c1_i32 : i32
    %14 = arith.extui %13 : i1 to i32
    %c0_i32_7 = arith.constant 0 : i32
    %15 = arith.cmpi ne, %14, %c0_i32_7 : i32
    scf.if %15 {
      %c0_8 = arith.constant 0 : index
      %c0_9 = arith.constant 0 : index
      %16 = vector.load %arg15[%c0_8, %c0_9] : memref<16x64xf32, #tpu.memory_space<vmem>>, vector<16x64xf32>
      %cst_10 = arith.constant 0.000000e+00 : f32
      %17 = vector.broadcast %cst_10 : f32 to vector<16x64xf32>
      %18 = arith.maximumf %16, %17 : vector<16x64xf32>
      %c0_11 = arith.constant 0 : index
      %c0_12 = arith.constant 0 : index
      %19 = vector.load %arg7[%c0_11, %c0_12] : memref<64x8xf32, #tpu.memory_space<vmem>>, vector<64x8xf32>
      %cst_13 = arith.constant dense<0.000000e+00> : vector<16x8xf32>
      %20 = tpu.matmul %18, %19, %cst_13 {dimension_numbers = #tpu.dot_dimension_numbers<[1], [0], [0], [1], [0, 0, 1, 1], [], []>} : vector<16x64xf32>, vector<64x8xf32>, vector<16x8xf32> -> vector<16x8xf32>
      %c0_14 = arith.constant 0 : index
      %c0_15 = arith.constant 0 : index
      %21 = vector.load %arg8[%c0_14, %c0_15] : memref<1x8xf32, #tpu.memory_space<vmem>>, vector<1x8xf32>
      %22 = vector.broadcast %21 : vector<1x8xf32> to vector<16x8xf32>
      %23 = arith.addf %20, %22 : vector<16x8xf32>
      %24 = vector.extract_strided_slice %23 {offsets = [0, 0], sizes = [16, 5], strides = [1, 1]} : vector<16x8xf32> to vector<16x5xf32>
      %25 = vector.extract_strided_slice %23 {offsets = [0, 5], sizes = [16, 1], strides = [1, 1]} : vector<16x8xf32> to vector<16x1xf32>
      %c0_16 = arith.constant 0 : index
      %c0_17 = arith.constant 0 : index
      %26 = vector.load %arg13[%c0_16, %c0_17] : memref<16x5xf32, #tpu.memory_space<vmem>>, vector<16x5xf32>
      %c0_18 = arith.constant 0 : index
      %c0_19 = arith.constant 0 : index
      %27 = vector.load %arg9[%c0_18, %c0_19] : memref<1x5xf32, #tpu.memory_space<vmem>>, vector<1x5xf32>
      %28 = vector.broadcast %27 : vector<1x5xf32> to vector<16x5xf32>
      %29 = arith.mulf %28, %26 : vector<16x5xf32>
      %30 = arith.addf %24, %29 : vector<16x5xf32>
      %31 = arith.mulf %26, %26 : vector<16x5xf32>
      %cst_20 = arith.constant dense<0.000000e+00> : vector<16xf32>
      %32 = vector.multi_reduction <add>, %31, %cst_20 [1] : vector<16x5xf32> to vector<16xf32>
      %33 = vector.shape_cast %32 : vector<16xf32> to vector<16x1xf32>
      %cst_21 = arith.constant -5.000000e-01 : f32
      %34 = vector.broadcast %cst_21 : f32 to vector<16x1xf32>
      %35 = arith.mulf %34, %33 : vector<16x1xf32>
      %c0_22 = arith.constant 0 : index
      %c0_23 = arith.constant 0 : index
      %36 = vector.load %arg10[%c0_22, %c0_23] : memref<1x2xf32, #tpu.memory_space<vmem>>, vector<1x1xf32>
      %37 = vector.broadcast %36 : vector<1x1xf32> to vector<16x1xf32>
      %38 = arith.addf %35, %37 : vector<16x1xf32>
      %cst_24 = arith.constant 0.000000e+00 : f32
      %39 = vector.broadcast %cst_24 : f32 to vector<16x1xf32>
      %c0_25 = arith.constant 0 : index
      %c1 = arith.constant 1 : index
      %40 = vector.load %arg10[%c0_25, %c1] : memref<1x2xf32, #tpu.memory_space<vmem>>, vector<1x1xf32>
      %41 = vector.broadcast %40 : vector<1x1xf32> to vector<16x1xf32>
      %42 = arith.addf %39, %41 : vector<16x1xf32>
      %cst_26 = arith.constant 1.000000e+00 : f32
      %43 = vector.broadcast %cst_26 : f32 to vector<16x5xf32>
      %44 = arith.addf %30, %43 : vector<16x5xf32>
      %c0_27 = arith.constant 0 : index
      %c0_28 = arith.constant 0 : index
      %45 = vector.load %arg12[%c0_27, %c0_28] : memref<1x5xf32, #tpu.memory_space<vmem>>, vector<1x5xf32>
      %46 = vector.broadcast %45 : vector<1x5xf32> to vector<16x5xf32>
      %47 = arith.mulf %44, %46 : vector<16x5xf32>
      %c0_29 = arith.constant 0 : index
      %c0_30 = arith.constant 0 : index
      %48 = vector.load %arg11[%c0_29, %c0_30] : memref<1x5xf32, #tpu.memory_space<vmem>>, vector<1x5xf32>
      %49 = vector.broadcast %48 : vector<1x5xf32> to vector<16x5xf32>
      %50 = arith.addf %47, %49 : vector<16x5xf32>
      %cst_31 = arith.constant 0.000000e+00 : f32
      %51 = vector.broadcast %cst_31 : f32 to vector<16x3xf32>
      %52 = tpu.concatenate %50, %30, %38, %42, %25, %51 in 1 : vector<16x5xf32>, vector<16x5xf32>, vector<16x1xf32>, vector<16x1xf32>, vector<16x1xf32>, vector<16x3xf32> -> vector<16x16xf32>
      %c0_32 = arith.constant 0 : index
      %c0_33 = arith.constant 0 : index
      %53 = vector.load %arg14[%c0_32, %c0_33] : memref<16x16xf32, #tpu.memory_space<vmem>>, vector<16x16xf32>
      tpu.vector_store %arg14[%c0_32, %c0_33], %52 {strides = array<i32>} : memref<16x16xf32, #tpu.memory_space<vmem>>, vector<16x16xf32>,
    } else {
    }
    return
  }
  func.func @transform_0(%arg0: i32, %arg1: i32) -> (i32, i32) {
    %c0_i32 = arith.constant 0 : i32
    return %arg0, %arg1 : i32, i32
  }
  func.func @transform_1(%arg0: i32, %arg1: i32) -> (i32, i32) {
    %c0_i32 = arith.constant 0 : i32
    %c0_i32_0 = arith.constant 0 : i32
    %c0_i32_1 = arith.constant 0 : i32
    return %c0_i32, %c0_i32_0 : i32, i32
  }
  func.func @transform_2(%arg0: i32, %arg1: i32) -> (i32, i32) {
    %c0_i32 = arith.constant 0 : i32
    %c0_i32_0 = arith.constant 0 : i32
    return %arg0, %c0_i32 : i32, i32
  }
  func.func @transform_3(%arg0: i32, %arg1: i32) -> (i32, i32) {
    %c0_i32 = arith.constant 0 : i32
    %c0_i32_0 = arith.constant 0 : i32
    %c0_i32_1 = arith.constant 0 : i32
    return %c0_i32, %c0_i32_0 : i32, i32
  }
  func.func @transform_4(%arg0: i32, %arg1: i32) -> (i32, i32) {
    %c0_i32 = arith.constant 0 : i32
    %c0_i32_0 = arith.constant 0 : i32
    %c0_i32_1 = arith.constant 0 : i32
    return %c0_i32, %c0_i32_0 : i32, i32
  }
  func.func @transform_5(%arg0: i32, %arg1: i32) -> (i32, i32) {
    %c0_i32 = arith.constant 0 : i32
    %c0_i32_0 = arith.constant 0 : i32
    %c0_i32_1 = arith.constant 0 : i32
    return %c0_i32, %c0_i32_0 : i32, i32
  }
  func.func @transform_6(%arg0: i32, %arg1: i32) -> (i32, i32) {
    %c0_i32 = arith.constant 0 : i32
    %c0_i32_0 = arith.constant 0 : i32
    %c0_i32_1 = arith.constant 0 : i32
    return %c0_i32, %c0_i32_0 : i32, i32
  }
  func.func @transform_7(%arg0: i32, %arg1: i32) -> (i32, i32) {
    %c0_i32 = arith.constant 0 : i32
    %c0_i32_0 = arith.constant 0 : i32
    %c0_i32_1 = arith.constant 0 : i32
    return %c0_i32, %c0_i32_0 : i32, i32
  }
  func.func @transform_8(%arg0: i32, %arg1: i32) -> (i32, i32) {
    %c0_i32 = arith.constant 0 : i32
    %c0_i32_0 = arith.constant 0 : i32
    %c0_i32_1 = arith.constant 0 : i32
    return %c0_i32, %c0_i32_0 : i32, i32
  }
  func.func @transform_9(%arg0: i32, %arg1: i32) -> (i32, i32) {
    %c0_i32 = arith.constant 0 : i32
    %c0_i32_0 = arith.constant 0 : i32
    %c0_i32_1 = arith.constant 0 : i32
    return %c0_i32, %c0_i32_0 : i32, i32
  }
  func.func @transform_10(%arg0: i32, %arg1: i32) -> (i32, i32) {
    %c0_i32 = arith.constant 0 : i32
    %c0_i32_0 = arith.constant 0 : i32
    %c0_i32_1 = arith.constant 0 : i32
    return %c0_i32, %c0_i32_0 : i32, i32
  }
  func.func @transform_11(%arg0: i32, %arg1: i32) -> (i32, i32) {
    %c0_i32 = arith.constant 0 : i32
    %c0_i32_0 = arith.constant 0 : i32
    return %arg0, %c0_i32 : i32, i32
  }
  func.func @transform_12(%arg0: i32, %arg1: i32) -> (i32, i32) {
    %c0_i32 = arith.constant 0 : i32
    %c0_i32_0 = arith.constant 0 : i32
    return %arg0, %c0_i32 : i32, i32
  }
}

</mosaic_0001>

<bundles_post_ra>
// kernel: tpu_custom_call.1
= control target key start
LH: loop header
LB: loop body
LE: loop exit
PB: predicated region body
PF: predicated region fallthrough
CT: control target
= control target key end

     0   :  { %s1440_s0 = inlined_call_operand.vmem [shape: f32[32,512], index: 0, kind: input, shape index: {}]   ;;  %s1441_s1 = inlined_call_operand.vmem [shape: bf16[512,64], index: 1, kind: input, shape index: {}]   ;;  %s1442_s2 = inlined_call_operand.vmem [shape: f32[32,1], index: 2, kind: input, shape index: {}]   ;;  %s1443_s3 = inlined_call_operand.vmem [shape: f32[1,64], index: 3, kind: input, shape index: {}]   ;;  %s1444_s4 = inlined_call_operand.vmem [shape: f32[1,64], index: 4, kind: input, shape index: {}]   ;;  %s1445_s5 = inlined_call_operand.vmem [shape: f32[64,8], index: 5, kind: input, shape index: {}]   ;;  %s1446_s6 = inlined_call_operand.vmem [shape: f32[1,8], index: 6, kind: input, shape index: {}]   ;;  %s1447_s7 = inlined_call_operand.vmem [shape: f32[1,5], index: 7, kind: input, shape index: {}]   ;;  %s1448_s8 = inlined_call_operand.vmem [shape: f32[1,2], index: 8, kind: input, shape index: {}]   ;;  %s1449_s9 = inlined_call_operand.vmem [shape: f32[1,5], index: 9, kind: input, shape index: {}]   ;;  %s1450_s10 = inlined_call_operand.vmem [shape: f32[1,5], index: 10, kind: input, shape index: {}]   ;;  %s1451_s11 = inlined_call_operand.vmem [shape: f32[32,5], index: 11, kind: input, shape index: {}]   ;;  %s1452_s12 = inlined_call_operand.vmem [shape: f32[32,16], index: 12, kind: output, shape index: {}]  }
   0x1   :  { %1455 = sst [smem:[#allocation6_spill]] %s1440_s0 }
   0x2   :  { %1456 = sst [smem:[#allocation7_spill]] %s1449_s9 }
   0x3   :  { %1457 = sst [smem:[#allocation8_spill]] %s1450_s10 }
   0x4   :  { %s1255_s21 = smov 0   ;;  %s1257_s22 = smov 0  }
   0x5   :  { %s1259_s23 = smov 0   ;;  %s1261_s24 = smov 0  }
   0x6   :  { %s1263_s25 = smov 0   ;;  %s1265_s26 = smov 0  }
   0x7   :  { %s1267_s27 = smov 0  }
   0x8 LB: > { %s31_s28 = sadd.s32 1, %s1176_s25  ;;  %s34_s29 = sadd.s32 1, %s1180_s26  ;;  %s1184_s27 = sphi %s1267_s27, %s22_s27   ;;  %s1180_s26 = sphi %s1265_s26, %s1470_s26   ;;  %s1176_s25 = sphi %s1263_s25, %s1469_s25   ;;  %s1172_s24 = sphi %s1261_s24, %s1468_s24   ;;  %s1168_s23 = sphi %s1259_s23, %s1467_s23   ;;  %s1164_s22 = sphi %s1257_s22, %s1466_s22   ;;  %s1160_s21 = sphi %s1255_s21, %s1465_s21  }
   0x9   : > { %p32_p0 = scmp.ge.s32.totalorder %s31_s28, 2  ;;  %p50_p1 = scmp.ne.s32.totalorder %s1164_s22, %s1160_s21 }
   0xa   : > { %p51_p2 = scmp.eq.s32.totalorder %s1184_s27, 0  ;;  %s43_s15 = sadd.s32 1, %s1164_s22 }
   0xb   : > { %s1472_s28 = smov (%p32_p0, %s31_s28), 0  ;;  %s1474_s29 = smov (!%p32_p0, %s34_s29), %s1180_s26 }
   0xc   : > { %1458 = sst [smem:[#allocation4_spill]] %s1472_s28  ;;  %p52_p3 = por %p51_p2, %p50_p1 }
   0xd   : > { %p36_p4 = scmp.ge.s32.totalorder %s1474_s29, 2  ;;  %s39_s30 = ssub.s32 %s1176_s25, %s1472_s28 }
   0xe   : > { %p951_p6 = scmp.ge.s32.totalorder %s1184_s27, 4 }
   0xf   : > { %s1476_s29 = smov (%p36_p4, %s1474_s29), 0 }
  0x10   : > { %1459 = sst [smem:[#allocation5_spill]] %s1476_s29  ;;  %s38_s13 = ssub.s32 %s1180_s26, %s1476_s29 }
  0x11   : > { %s40_s14 = sor.u32 %s39_s30, %s38_s13  ;;  %370 = sbr.rel (%p951_p6) target bundleno = 36 (0x24), region = 52 }
  0x12   : > { %p41_p5 = scmp.eq.s32.totalorder %s40_s14, 0 }
  0x14   : > { %s1306_s16 = scalar_select %p41_p5, %s1164_s22, %s43_s15  }
  0x16   : > { %373 = sbr.rel (!%p52_p3) target bundleno = 36 (0x24), region = 56  ;;  %s375_s17 = sand.u32 (%p52_p3), 1, %s1164_s22  }
  0x17   : > { %s954_s18 = sshll.u32 (%p52_p3), %s1176_s25, 1  ;;  %s952_s19 = sshll.u32 (%p52_p3), %s375_s17, 5 }
  0x18   : > { %s1037_s20 = sshll.u32 (%p52_p3), %s1180_s26, 3  ;;  %s1460_s0 = sld [smem:[#allocation6_spill]] (%p52_p3) }
  0x19   : > { %s381_s28 = sadd.s32 (%p52_p3), %s1037_s20, %s954_s18  ;;  %s377_s13 = scalar_lea.vmem (%p52_p3), [#allocation3], %s952_s19 }
  0x1a   : > { %s956_s9 = sshll.u32 (%p52_p3), %s381_s28, 3 }
  0x1e   : > { %s383_s30 = scalar_lea.vmem %s1460_s0, %s956_s9 }
  0x1f   : > { %v396_v0 = vld [vmem:[%s383_s30] sm:$0xff]  ;;  %v398_v1 = vld [vmem:[%s383_s30 + $0x8] sm:$0xff] }
  0x20   : > { %v400_v2 = vld [vmem:[%s383_s30 + $0x20] sm:$0xff]  ;;  %397 = vst [vmem:[%s377_s13] sm:$0xff] %v396_v0  ;;  %v402_v3 = vld [vmem:[%s383_s30 + $0x28] sm:$0xff] }
  0x21   : > { %399 = vst [vmem:[%s377_s13 + $0x8] sm:$0xff] %v398_v1 }
  0x22   : > { %401 = vst [vmem:[%s377_s13 + $0x10] sm:$0xff] %v400_v2 }
  0x23   : > { %403 = vst [vmem:[%s377_s13 + $0x18] sm:$0xff] %v402_v3 }
  0x24 PF: > { %p957_p7 = scmp.ge.s32.totalorder %s1184_s27, 1  ;;  %p426_p8 = scmp.lt.s32.totalorder %s1184_s27, 5 }
  0x26   : > { %p427_p9 = pnand %p957_p7, %p426_p8 }
  0x27   : > { %s433_s9 = sand.u32 (!%p427_p9), 1, %s1160_s21   ;;  %s959_s10 = sshll.u32 (!%p427_p9), %s1172_s24, 1 }
  0x28   : > { %430 = sbr.rel (%p427_p9) target bundleno = 636 (0x27c), region = 87  ;;  %s958_s28 = sshll.u32 (!%p427_p9), %s433_s9, 5 }
  0x29   : > { %p487_p10 = scmp.lt.s32.totalorder (!%p427_p9), %s959_s10, 3  ;;  %s1332_s21 = scalar_lea.vmem (!%p427_p9), [#allocation3], %s958_s28 }
  0x2a   : > { %p965_p11 = scmp.ne.s32.totalorder (!%p427_p9), %s1168_s23, 0 }
  0x2d   : > { %s1478_s10 = smov (!%p487_p10, %s959_s10), 3  ;;  %507 = sbr.rel (%p965_p11) target bundleno = 180 (0xb4), region = 95 }
  0x2e   : > { %s960_s29 = sshll.u32 %s1478_s10, 3 }
  0x2f   : > { %s490_s17 = scalar_lea.vmem %s1442_s2, %s960_s29  ;;  %s1325_s20 = scalar_lea.vmem %s1451_s11, %s960_s29 }
  0x30   : > { %s1330_s0 = scalar_lea.vmem %s1452_s12, %s960_s29 }
  0x32   : > { %v508_v4 = vld [vmem:[%s490_s17] sm:$0xff]  ;;  %v1186_v5 = vmov 0   ;;  %v509_v6 = vld [vmem:[%s490_s17 + $0x8] sm:$0xff]  ;;  %vm532_vm0 = vcmask 523264  }
  0x33   : > { %1122 = vset.pattern.permute.xlu0 %v1186_v5  ;;  %v1123_v7 = vld [vmem:[%s1443_s3] ss:$0 sm:$0xff] }
  0x34   : > { %513 = vperm.xlu0 %1122, %v508_v4   ;;  %v1124_v8 = vld [vmem:[%s1444_s4] ss:$0 sm:$0xff] }
  0x3c   : > { %518 = vperm.xlu0 %1122, %v509_v6  }
  0xa6   : > { %v514_v9 = vpop.permute.xlu0 %513 }
  0xa7   : > { %v524_v10 = vmul.f32 %v1123_v7, %v514_v9 }
  0xa9   : > { %v530_v11 = vadd.f32 %v1124_v8, %v524_v10 }
  0xab   : > { %533 = vst.msk [vmem:[#allocation2] sm:$0xff] %vm532_vm0, %v530_v11 }
  0xae   : > { %v519_v12 = vpop.permute.xlu0 %518 }
  0xaf   : > { %v525_v13 = vmul.f32 %v1123_v7, %v519_v12 }
  0xb1   : > { %v531_v14 = vadd.f32 %v1124_v8, %v525_v13 }
  0xb3   : > { %534 = vst.msk [vmem:[#allocation2 + $0x8] sm:$0xff] %vm532_vm0, %v531_v14 }
  0xb4 PF: > { %s966_s28 = sshll.u32 %s1168_s23, 8  ;;  %v574_v29 = vld [vmem:[%s1332_s21] sm:$0xff]  ;;  %v576_v30 = vld [vmem:[%s1332_s21 + $0x10] sm:$0xff]  ;;  %v575_v31 = vld [vmem:[%s1332_s21 + $0x8] sm:$0xff]  ;;  %vm706_vm1 = vcmask 523264   ;;  %p1032_p12 = scmp.ne.s32.totalorder %s1168_s23, 1 }
  0xb5   : > { %s536_s29 = sshra.s32 %s966_s28, 3  ;;  %v577_v34 = vld [vmem:[%s1332_s21 + $0x18] sm:$0xff]  ;;  %v578_v35 = vpack.c.bf16 %v576_v30, %v574_v29  ;;  %v572_v38 = vld [vmem:[#allocation2] sm:$0xff]  ;;  %s1187_s24 = smov (!%p1032_p12), 10  }
  0xb6   : > { %s967_s15 = sshll.u32 %s536_s29, 2  ;;  %v579_v36 = vpack.c.bf16 %v577_v34, %v575_v31  ;;  %s1188_s28 = smov (!%p1032_p12), 7  }
  0xb7   : > { %s1345_s19 = scalar_lea.vmem %s1441_s1, %s967_s15  ;;  %s1189_s29 = smov (!%p1032_p12), 5  }
  0xb8   : > { %v1045_v15 = vld [vmem:[%s1345_s19 + $0x38] sm:$0xff]  ;;  %v1044_v17 = vld [vmem:[%s1345_s19 + $0x30] sm:$0xff]  ;;  %v1043_v19 = vld [vmem:[%s1345_s19 + $0x28] sm:$0xff]  ;;  %s1462_s30 = sld [smem:[#allocation7_spill]] (!%p1032_p12) }
  0xb9   : > { %v1053_v16 = vld [vmem:[%s1345_s19 + $0x78] sm:$0xff]  ;;  %676 = vmatpush.bf16.msra.mxu0 %v1045_v15  ;;  %v1052_v18 = vld [vmem:[%s1345_s19 + $0x70] sm:$0xff]  ;;  %v1051_v20 = vld [vmem:[%s1345_s19 + $0x68] sm:$0xff] }
  0xba   : > { %690 = vmatpush.bf16.msra.mxu1 %v1053_v16  ;;  %v1042_v21 = vld [vmem:[%s1345_s19 + $0x20] sm:$0xff]  ;;  %v1041_v23 = vld [vmem:[%s1345_s19 + $0x18] sm:$0xff]  ;;  %v1040_v25 = vld [vmem:[%s1345_s19 + $0x10] sm:$0xff] }
  0xbb   : > { %v1050_v22 = vld [vmem:[%s1345_s19 + $0x60] sm:$0xff]  ;;  %v1049_v24 = vld [vmem:[%s1345_s19 + $0x58] sm:$0xff]  ;;  %v1048_v26 = vld [vmem:[%s1345_s19 + $0x50] sm:$0xff] }
  0xbc   : > { %v1039_v27 = vld [vmem:[%s1345_s19 + $0x8] sm:$0xff]  ;;  %v1038_v32 = vld [vmem:[%s1345_s19] sm:$0xff] }
  0xbd   : > { %677 = vmatpush.bf16.msra.mxu0 %v1044_v17  ;;  %v1047_v28 = vld [vmem:[%s1345_s19 + $0x48] sm:$0xff]  ;;  %v1046_v33 = vld [vmem:[%s1345_s19 + $0x40] sm:$0xff] }
  0xbe   : > { %691 = vmatpush.bf16.msra.mxu1 %v1052_v18  ;;  %v573_v43 = vld [vmem:[#allocation2 + $0x8] sm:$0xff] }
  0xc1   : > { %678 = vmatpush.bf16.msra.mxu0 %v1043_v19 }
  0xc2   : > { %692 = vmatpush.bf16.msra.mxu1 %v1051_v20 }
  0xc5   : > { %679 = vmatpush.bf16.msra.mxu0 %v1042_v21 }
  0xc6   : > { %693 = vmatpush.bf16.msra.mxu1 %v1050_v22 }
  0xc9   : > { %680 = vmatpush.bf16.msra.mxu0 %v1041_v23 }
  0xca   : > { %694 = vmatpush.bf16.msra.mxu1 %v1049_v24 }
  0xcd   : > { %681 = vmatpush.bf16.msra.mxu0 %v1040_v25 }
  0xce   : > { %695 = vmatpush.bf16.msra.mxu1 %v1048_v26 }
  0xd1   : > { %682 = vmatpush.bf16.msra.mxu0 %v1039_v27 }
  0xd2   : > { %696 = vmatpush.bf16.msra.mxu1 %v1047_v28 }
  0xd5   : > { %683 = vmatpush.bf16.msra.mxu0 %v1038_v32 }
  0xd6   : > { %697 = vmatpush.bf16.msra.mxu1 %v1046_v33 }
  0xd8   : > { %684 = vmatmul.bf16.vlgmr.msra.gmra.mxu0 %v578_v35 }
  0xd9   : > { %698 = vmatmul.bf16.vlgmr.msra.gmra.mxu1 %v579_v36 }
 0x155   : > { %v685_v37 = vpop.f32.mrf.mxu0 }
 0x156   : > { %v699_v39 = vpop.f32.mrf.mxu1 }
 0x157   : > { %v700_v40 = vadd.f32 %v699_v39, %v685_v37 }
 0x159   : > { %v704_v41 = vadd.f32 %v700_v40, %v572_v38 }
 0x15b   : > { %707 = vst.msk [vmem:[#allocation2] sm:$0xff] %vm706_vm1, %v704_v41 }
 0x15d   : > { %v687_v42 = vpop.f32.mrf.mxu0 }
 0x15e   : > { %v701_v44 = vpop.f32.mrf.mxu1 }
 0x15f   : > { %v702_v45 = vadd.f32 %v701_v44, %v687_v42  ;;  %712 = sbr.rel (%p1032_p12) target bundleno = 636 (0x27c), region = 99 }
 0x161   : > { %v705_v46 = vadd.f32 %v702_v45, %v573_v43 }
 0x163   : > { %708 = vst.msk [vmem:[#allocation2 + $0x8] sm:$0xff] %vm706_vm1, %v705_v46 }
 0x164   : > { %v724_v47 = vld [vmem:[%s1445_s5 + $0x38] sm:$0xff]  ;;  %v723_v48 = vld [vmem:[%s1445_s5 + $0x30] sm:$0xff]  ;;  %v722_v49 = vld [vmem:[%s1445_s5 + $0x28] sm:$0xff]  ;;  %vm770_vm2 = vcmask 39936   ;;  %vm830_vm3 = vcmask 80896   ;;  %vm833_vm4 = vcmask 89088  }
 0x165   : > { %743 = vmatpush.msra.mxu0 %v724_v47  ;;  %1054 = vmatpush.msra.mxu1 %v724_v47  ;;  %v758_v50 = vld [vmem:[%s1325_s20] sm:$0xff]  ;;  %v759_v53 = vld [vmem:[%s1325_s20 + $0x8] sm:$0xff]  ;;  %v720_v55 = vld [vmem:[%s1445_s5 + $0x18] sm:$0xff]  ;;  %s1461_s20 = sld [smem:[#allocation8_spill]]  ;;  %vm836_vm5 = vcmask 97280   ;;  %vm839_vm6 = vcmask 105472  }
 0x166   : > { %v721_v51 = vld [vmem:[%s1445_s5 + $0x20] sm:$0xff]  ;;  %v768_v52 = vmul.f32 %v758_v50, %v758_v50  ;;  %v769_v56 = vmul.f32 %v759_v53, %v759_v53  ;;  %v719_v57 = vld [vmem:[%s1445_s5 + $0x10] sm:$0xff]  ;;  %v718_v60 = vld [vmem:[%s1445_s5 + $0x8] sm:$0xff]  ;;  %vm842_vm7 = vcmask 130048  }
 0x167   : > { %744 = vmatpush.msra.mxu0 %v723_v48  ;;  %1055 = vmatpush.msra.mxu1 %v723_v48  ;;  %v713_v58 = vld [vmem:[#allocation2] sm:$0xff] }
 0x168   : > { %v771_v54 = vsel %vm770_vm2, %v768_v52, 0.0  ;;  %v774_v61 = vsel %vm770_vm2, %v769_v56, 0.0  ;;  %v717_v62 = vld [vmem:[%s1445_s5] sm:$0xff]  ;;  %v715_v63 = vmax.f32 %v713_v58, 0.0 }
 0x169   : > { %745 = vmatpush.msra.mxu0 %v722_v49  ;;  %1056 = vmatpush.msra.mxu1 %v722_v49  ;;  %v1125_v1 = vld [vmem:[%s1448_s8] ss:$0 sm:$0xff] }
 0x16a   : > { %772 = vadd.xlane.f32.xlu0 %v771_v54  ;;  %v714_v59 = vld [vmem:[#allocation2 + $0x8] sm:$0xff]  ;;  %v1127_v8 = vld [vmem:[%s1447_s7] ss:$0 sm:$0xff] }
 0x16b   : > { %746 = vmatpush.msra.mxu0 %v721_v51  ;;  %1057 = vmatpush.msra.mxu1 %v721_v51  ;;  %v716_v0 = vmax.f32 %v714_v59, 0.0  ;;  %v1126_v9 = vld [vmem:[%s1446_s6] ss:$0 sm:$0xff]  ;;  %v764_v10 = vmul.f32 %v1127_v8, %v758_v50  ;;  %v765_v16 = vmul.f32 %v1127_v8, %v759_v53 }
 0x16c   : > { %v1128_v20 = vld [vmem:[%s1461_s20] ss:$0 sm:$0xff] }
 0x16d   : > { %747 = vmatpush.msra.mxu0 %v720_v55  ;;  %1058 = vmatpush.msra.mxu1 %v720_v55  ;;  %v1129_v25 = vld [vmem:[%s1462_s30] ss:$0 sm:$0xff] }
 0x16f   : > { %748 = vmatpush.msra.mxu0 %v719_v57  ;;  %1059 = vmatpush.msra.mxu1 %v719_v57 }
 0x171   : > { %749 = vmatpush.msra.mxu0 %v718_v60  ;;  %1060 = vmatpush.msra.mxu1 %v718_v60 }
 0x172   : > { %775 = vadd.xlane.f32.xlu0 %v774_v61 }
 0x173   : > { %750 = vmatpush.msra.mxu0 %v717_v62  ;;  %1061 = vmatpush.msra.mxu1 %v717_v62 }
 0x174   : > { %1033 = vmatmul.msk.f32.vlgmr.msra.gmra.mxu0 %vm706_vm1, %v715_v63  ;;  %1034 = vmatmul.msk.f32.vlgmr.msra.gmra.mxu1 %vm706_vm1, %v716_v0 }
 0x186   : > { %817 = vrot.lane.b32.xlu0 %v1125_v1, %s1187_s24 }
 0x1dd   : > { %v773_v2 = vpop.xlane.xlu0 %772 }
 0x1de   : > { %v777_v3 = vmul.f32 -0.5, %v773_v2 }
 0x1e0   : > { %v783_v4 = vadd.f32 %v1125_v1, %v777_v3 }
 0x1e2   : > { %810 = vrot.lane.b32.xlu2 %v783_v4, %s1187_s24 }
 0x1e5   : > { %v776_v5 = vpop.xlane.xlu0 %775 }
 0x1e6   : > { %v778_v6 = vmul.f32 -0.5, %v776_v5 }
 0x1e8   : > { %v784_v7 = vadd.f32 %v1125_v1, %v778_v6 }
 0x1ea   : > { %812 = vrot.lane.b32.xlu2 %v784_v7, %s1187_s24 }
 0x1f1   : > { %v752_v11 = vpop.f32.mrf.mxu0  ;;  %v755_v12 = vpop.f32.mrf.mxu1 }
 0x1f2   : > { %v753_v13 = vadd.f32 %v1126_v9, %v752_v11  ;;  %v756_v14 = vadd.f32 %v1126_v9, %v755_v12 }
 0x1f4   : > { %v766_v15 = vadd.f32 %v764_v10, %v753_v13  ;;  %824 = vrot.lane.b32.xlu2 %v756_v14, %s1188_s28  ;;  %v767_v17 = vadd.f32 %v765_v16, %v756_v14 }
 0x1f6   : > { %802 = vrot.lane.b32.xlu1 %v766_v15, %s1189_s29  ;;  %v787_v19 = vadd.f32 1.0, %v767_v17  ;;  %v786_v21 = vadd.f32 1.0, %v766_v15 }
 0x1f8   : > { %v793_v23 = vmul.f32 %v1128_v20, %v787_v19  ;;  %v792_v24 = vmul.f32 %v1128_v20, %v786_v21  ;;  %v818_v33 = vpop.permute.xlu0 %817 }
 0x1fa   : > { %v799_v27 = vadd.f32 %v1129_v25, %v793_v23  ;;  %v798_v28 = vadd.f32 %v1129_v25, %v792_v24 }
 0x1fe   : > { %804 = vrot.lane.b32.xlu1 %v767_v17, %s1189_s29 }
 0x206   : > { %822 = vrot.lane.b32.xlu1 %v753_v13, %s1188_s28 }
 0x23c   : > { %v811_v18 = vpop.permute.xlu2 %810 }
 0x244   : > { %v813_v26 = vpop.permute.xlu2 %812 }
 0x24e   : > { %v825_v36 = vpop.permute.xlu2 %824 }
 0x268   : > { %v803_v22 = vpop.permute.xlu1 %802 }
 0x269   : > { %v828_v31 = vsel %vm770_vm2, %v798_v28, %v803_v22 }
 0x26a   : > { %v831_v34 = vsel %vm830_vm3, %v828_v31, %v811_v18 }
 0x26b   : > { %v834_v37 = vsel %vm833_vm4, %v831_v34, %v818_v33 }
 0x270   : > { %v805_v29 = vpop.permute.xlu1 %804 }
 0x271   : > { %v829_v30 = vsel %vm770_vm2, %v799_v27, %v805_v29 }
 0x272   : > { %v832_v32 = vsel %vm830_vm3, %v829_v30, %v813_v26 }
 0x273   : > { %v835_v35 = vsel %vm833_vm4, %v832_v32, %v818_v33 }
 0x274   : > { %v838_v38 = vsel %vm836_vm5, %v835_v35, %v825_v36 }
 0x275   : > { %v841_v42 = vsel %vm839_vm6, %v838_v38, 0.0 }
 0x276   : > { %844 = vst.msk [vmem:[%s1330_s0 + $0x8] sm:$0xff] %vm842_vm7, %v841_v42 }
 0x278   : > { %v823_v39 = vpop.permute.xlu1 %822 }
 0x279   : > { %v837_v40 = vsel %vm836_vm5, %v834_v37, %v823_v39 }
 0x27a   : > { %v840_v41 = vsel %vm839_vm6, %v837_v40, 0.0 }
 0x27b   : > { %843 = vst.msk [vmem:[%s1330_s0] sm:$0xff] %vm842_vm7, %v840_v41 }
 0x27c PF: > { %s22_s27 = sadd.s32 1, %s1184_s27   ;;  %s1463_s13 = sld [smem:[#allocation4_spill]] }
 0x27d   : > { %p19_p13 = scmp.ge.s32.totalorder %s22_s27, 6   ;;  %s1464_s9 = sld [smem:[#allocation5_spill]] }
 0x27e   : > { %s1465_s21 = smov %s1164_s22  ;;  %s1466_s22 = smov %s1306_s16 }
 0x27f   : > { %s1467_s23 = smov %s1176_s25  ;;  %s1468_s24 = smov %s1180_s26 }
 0x280   :  { %21 = sbr.rel (!%p19_p13) target bundleno = 8 (0x8), region = 141 }
 0x282   : > { %s1469_s25 = smov %s1463_s13 }
 0x283   : > { %s1470_s26 = smov %s1464_s9 }

</bundles_post_ra>
